<compile_context>
chip_gen: v7x
topology: tpu7x:2x2x1
jax: 0.10.0
libtpu: 0.0.40
codegen_flags: <defaults>
</compile_context>

<pallas_src>
import functools

import jax
import jax.numpy as jnp
from jax.experimental import pallas as pl
from jax.experimental.pallas import tpu as pltpu

_LANE = 128      # lane width of a vreg (last dim)
_SUBLANE = 8     # sublane width of a vreg (second-to-last dim)


def _round_up(x, m):
    return (x + m - 1) // m * m


def _fused_mlp_kernel(x_ref, ws_ref, bs_ref, o_ref, *, num_layers):
    """Fused hot path: h = relu(h @ W_l + b_l) for l in 0..L-1, f32 MXU acc."""
    h = x_ref[...]                                          # (tile_b, P) f32
    for l in range(num_layers):                             # static unroll (L small)
        y = jnp.dot(h, ws_ref[l], preferred_element_type=jnp.float32)
        y = y + bs_ref[l]                                   # (tb,P) + (1,P) broadcast
        h = jnp.maximum(y, 0.0)                             # ReLU; Dropout = identity
    o_ref[...] = h.astype(o_ref.dtype)


def mlp_forward(x, ws, bs, out_dim, *, tile_b=512):
    """Run the fused MLP.

    x  : (B, Din) unpadded activations.
    ws : (L, P, P) zero-padded, pre-transposed weights (in_features, out_features).
    bs : (L, 1, P) zero-padded biases.
    Returns (B, out_dim).
    """
    B, Din = x.shape
    L, P, _ = ws.shape

    # Pad batch to a sublane multiple and pick a lane-dense batch tile.
    Bp = _round_up(B, _SUBLANE)
    tb = min(Bp, tile_b)                  # both are multiples of 8
    Bp = _round_up(Bp, tb)

    xp = jnp.zeros((Bp, P), x.dtype).at[:B, :Din].set(x)

    kernel = functools.partial(_fused_mlp_kernel, num_layers=L)
    out = pl.pallas_call(
        kernel,
        out_shape=jax.ShapeDtypeStruct((Bp, P), x.dtype),
        grid_spec=pltpu.PrefetchScalarGridSpec(
            num_scalar_prefetch=0,
            grid=(Bp // tb,),
            in_specs=[
                pl.BlockSpec((tb, P), lambda i: (i, 0)),       # activation tile
                pl.BlockSpec((L, P, P), lambda i: (0, 0, 0)),  # all weights, resident
                pl.BlockSpec((L, 1, P), lambda i: (0, 0, 0)),  # all biases, resident
            ],
            out_specs=pl.BlockSpec((tb, P), lambda i: (i, 0)),
        ),
        compiler_params=pltpu.CompilerParams(
            dimension_semantics=("parallel",)),  # 2-TC sharding on v7x, no-op on v5e/v6e
    )(xp, ws, bs)
    return out[:B, :out_dim]


def init_mlp_params(key, layer_sizes):
    """Deterministic init matching nn.Linear shapes/ranges.

    torch stores weight as (out, in); we store the transpose (in, out) so the
    kernel does x @ W.  Weights/biases are zero-padded to (P, P)/(1, P) with
    P = next 128-multiple of the widest layer, then stacked along a layer axis.
    """
    P = _round_up(max(layer_sizes), _LANE)
    raw = []
    for din, dout in zip(layer_sizes[:-1], layer_sizes[1:]):
        key, kw, kb = jax.random.split(key, 3)
        bound = 1.0 / (din ** 0.5)  # same range as torch's default init
        w = jax.random.uniform(kw, (din, dout), jnp.float32, -bound, bound)
        b = jax.random.uniform(kb, (dout,), jnp.float32, -bound, bound)
        raw.append((w, b))

    L = len(raw)
    ws = jnp.zeros((L, P, P), jnp.float32)
    bs = jnp.zeros((L, 1, P), jnp.float32)
    for l, (w, b) in enumerate(raw):
        din, dout = w.shape
        ws = ws.at[l, :din, :dout].set(w)
        bs = bs.at[l, 0, :dout].set(b)
    return raw, ws, bs


def mlp_forward_ref(x, raw_params):
    # Pure-JAX reference (unpadded) for the correctness sanity check.
    for w, b in raw_params:
        x = jnp.maximum(jnp.dot(x, w) + b, 0.0)
    return x


if __name__ == "__main__":
    layer_sizes = [32, 64, 64, 16]   # MLPModel(layer_sizes)
    batch = 8

    key = jax.random.PRNGKey(0)
    key, kx = jax.random.split(key)
    x = jax.random.normal(kx, (batch, layer_sizes[0]), jnp.float32)
    raw, ws, bs = init_mlp_params(key, layer_sizes)

    fwd = jax.jit(functools.partial(mlp_forward, out_dim=layer_sizes[-1]))
    out = fwd(x, ws, bs)
    out = jax.block_until_ready(out)

    ref = mlp_forward_ref(x, raw)
    assert out.shape == (batch, layer_sizes[-1])
    assert jnp.allclose(out, ref, atol=1e-5, rtol=1e-5)

    print("KERNEL_OK")
</pallas_src>

<mosaic_0001>
module attributes {stable_mosaic.version = 11 : i64} {
  func.func @_fused_mlp_kernel(%arg0: i32, %arg1: memref<8x128xf32, #tpu.memory_space<vmem>>, %arg2: memref<3x128x128xf32, #tpu.memory_space<vmem>>, %arg3: memref<3x1x128xf32, #tpu.memory_space<vmem>>, %arg4: memref<8x128xf32, #tpu.memory_space<vmem>>) attributes {dimension_semantics = [#tpu.dimension_semantics<parallel>], iteration_bounds = array<i64: 1>, scalar_prefetch = 0 : i64, scratch_operands = 0 : i64, tpu.core_type = #tpu.core_type<tc>, window_params = [{transform_indices = @transform_0, window_bounds = array<i64: 8, 128>}, {pipeline_mode = #tpu.pipeline_mode<synchronous>, transform_indices = @transform_1, window_bounds = array<i64: 3, 128, 128>}, {pipeline_mode = #tpu.pipeline_mode<synchronous>, transform_indices = @transform_2, window_bounds = array<i64: 3, 1, 128>}, {transform_indices = @transform_3, window_bounds = array<i64: 8, 128>}]} {
    %c0 = arith.constant 0 : index
    %c0_0 = arith.constant 0 : index
    %0 = vector.load %arg1[%c0, %c0_0] : memref<8x128xf32, #tpu.memory_space<vmem>>, vector<8x128xf32>
    %c0_1 = arith.constant 0 : index
    %c0_2 = arith.constant 0 : index
    %c0_3 = arith.constant 0 : index
    %1 = vector.load %arg2[%c0_1, %c0_2, %c0_3] : memref<3x128x128xf32, #tpu.memory_space<vmem>>, vector<1x128x128xf32>
    %2 = vector.shape_cast %1 : vector<1x128x128xf32> to vector<128x128xf32>
    %cst = arith.constant dense<0.000000e+00> : vector<8x128xf32>
    %3 = tpu.matmul %0, %2, %cst {dimension_numbers = #tpu.dot_dimension_numbers<[1], [0], [0], [1], [0, 0, 1, 1], [], []>} : vector<8x128xf32>, vector<128x128xf32>, vector<8x128xf32> -> vector<8x128xf32>
    %c0_4 = arith.constant 0 : index
    %c0_5 = arith.constant 0 : index
    %c0_6 = arith.constant 0 : index
    %4 = vector.load %arg3[%c0_4, %c0_5, %c0_6] : memref<3x1x128xf32, #tpu.memory_space<vmem>>, vector<1x1x128xf32>
    %5 = vector.shape_cast %4 : vector<1x1x128xf32> to vector<1x128xf32>
    %6 = vector.broadcast %5 : vector<1x128xf32> to vector<8x128xf32>
    %7 = arith.addf %3, %6 : vector<8x128xf32>
    %cst_7 = arith.constant 0.000000e+00 : f32
    %8 = vector.broadcast %cst_7 : f32 to vector<8x128xf32>
    %9 = arith.maximumf %7, %8 : vector<8x128xf32>
    %c1 = arith.constant 1 : index
    %c0_8 = arith.constant 0 : index
    %c0_9 = arith.constant 0 : index
    %10 = vector.load %arg2[%c1, %c0_8, %c0_9] : memref<3x128x128xf32, #tpu.memory_space<vmem>>, vector<1x128x128xf32>
    %11 = vector.shape_cast %10 : vector<1x128x128xf32> to vector<128x128xf32>
    %cst_10 = arith.constant dense<0.000000e+00> : vector<8x128xf32>
    %12 = tpu.matmul %9, %11, %cst_10 {dimension_numbers = #tpu.dot_dimension_numbers<[1], [0], [0], [1], [0, 0, 1, 1], [], []>} : vector<8x128xf32>, vector<128x128xf32>, vector<8x128xf32> -> vector<8x128xf32>
    %c1_11 = arith.constant 1 : index
    %c0_12 = arith.constant 0 : index
    %c0_13 = arith.constant 0 : index
    %13 = vector.load %arg3[%c1_11, %c0_12, %c0_13] : memref<3x1x128xf32, #tpu.memory_space<vmem>>, vector<1x1x128xf32>
    %14 = vector.shape_cast %13 : vector<1x1x128xf32> to vector<1x128xf32>
    %15 = vector.broadcast %14 : vector<1x128xf32> to vector<8x128xf32>
    %16 = arith.addf %12, %15 : vector<8x128xf32>
    %cst_14 = arith.constant 0.000000e+00 : f32
    %17 = vector.broadcast %cst_14 : f32 to vector<8x128xf32>
    %18 = arith.maximumf %16, %17 : vector<8x128xf32>
    %c2 = arith.constant 2 : index
    %c0_15 = arith.constant 0 : index
    %c0_16 = arith.constant 0 : index
    %19 = vector.load %arg2[%c2, %c0_15, %c0_16] : memref<3x128x128xf32, #tpu.memory_space<vmem>>, vector<1x128x128xf32>
    %20 = vector.shape_cast %19 : vector<1x128x128xf32> to vector<128x128xf32>
    %cst_17 = arith.constant dense<0.000000e+00> : vector<8x128xf32>
    %21 = tpu.matmul %18, %20, %cst_17 {dimension_numbers = #tpu.dot_dimension_numbers<[1], [0], [0], [1], [0, 0, 1, 1], [], []>} : vector<8x128xf32>, vector<128x128xf32>, vector<8x128xf32> -> vector<8x128xf32>
    %c2_18 = arith.constant 2 : index
    %c0_19 = arith.constant 0 : index
    %c0_20 = arith.constant 0 : index
    %22 = vector.load %arg3[%c2_18, %c0_19, %c0_20] : memref<3x1x128xf32, #tpu.memory_space<vmem>>, vector<1x1x128xf32>
    %23 = vector.shape_cast %22 : vector<1x1x128xf32> to vector<1x128xf32>
    %24 = vector.broadcast %23 : vector<1x128xf32> to vector<8x128xf32>
    %25 = arith.addf %21, %24 : vector<8x128xf32>
    %cst_21 = arith.constant 0.000000e+00 : f32
    %26 = vector.broadcast %cst_21 : f32 to vector<8x128xf32>
    %27 = arith.maximumf %25, %26 : vector<8x128xf32>
    %c0_22 = arith.constant 0 : index
    %c0_23 = arith.constant 0 : index
    %28 = vector.load %arg4[%c0_22, %c0_23] : memref<8x128xf32, #tpu.memory_space<vmem>>, vector<8x128xf32>
    tpu.vector_store %arg4[%c0_22, %c0_23], %27 {strides = array<i32>} : memref<8x128xf32, #tpu.memory_space<vmem>>, vector<8x128xf32>,
    return
  }
  func.func @transform_0(%arg0: i32) -> (i32, i32) {
    %c0_i32 = arith.constant 0 : i32
    %c0_i32_0 = arith.constant 0 : i32
    return %arg0, %c0_i32 : i32, i32
  }
  func.func @transform_1(%arg0: i32) -> (i32, i32, i32) {
    %c0_i32 = arith.constant 0 : i32
    %c0_i32_0 = arith.constant 0 : i32
    %c0_i32_1 = arith.constant 0 : i32
    %c0_i32_2 = arith.constant 0 : i32
    return %c0_i32, %c0_i32_0, %c0_i32_1 : i32, i32, i32
  }
  func.func @transform_2(%arg0: i32) -> (i32, i32, i32) {
    %c0_i32 = arith.constant 0 : i32
    %c0_i32_0 = arith.constant 0 : i32
    %c0_i32_1 = arith.constant 0 : i32
    %c0_i32_2 = arith.constant 0 : i32
    return %c0_i32, %c0_i32_0, %c0_i32_1 : i32, i32, i32
  }
  func.func @transform_3(%arg0: i32) -> (i32, i32) {
    %c0_i32 = arith.constant 0 : i32
    %c0_i32_0 = arith.constant 0 : i32
    return %arg0, %c0_i32 : i32, i32
  }
}

</mosaic_0001>

<bundles_post_ra>
// kernel: mlp_forward.1
= control target key start
LH: loop header
LB: loop body
LE: loop exit
PB: predicated region body
PF: predicated region fallthrough
CT: control target
= control target key end

     0   :  { %8 = vsyncpa [#allocation3], 0  ;;  %s713_s0 = inlined_call_operand.vmem [shape: f32[8,128], index: 0, kind: input, shape index: {}]   ;;  %s714_s1 = inlined_call_operand.hbm [shape: f32[3,128,128], index: 1, kind: input, shape index: {}]   ;;  %s715_s2 = inlined_call_operand.vmem [shape: f32[3,1,128], index: 2, kind: input, shape index: {}]   ;;  %s716_s3 = inlined_call_operand.hbm [shape: f32[8,128], index: 3, kind: output, shape index: {}]  }
   0x1   :  { %9 = vsyncpa [#allocation4], 0  ;;  %s620_s12 = smov [#allocation2]   ;;  %s572_s16 = scalar_lea.hbm %s714_s1, 6144 }
   0x2   :  { %s17_s13 = sshll.u32 %s620_s12, 4  ;;  %p573_p0 = scmp.ne.s32.totalorder %s714_s1, %s572_s16  ;;  %s18_s13 = int_to_ptr.vmem [resolvable:$true] %s17_s13 }
   0x3   :  { %p576_p1 = scmp.lt.u32.totalorder %s572_s16, %s714_s1 }
   0x5   :  { %p578_p2 = pnand %p576_p1, %p573_p0 }
   0x7   :  { %581 = shalt.err (!%p578_p2)
}
   0x8   :  { %s582_s21 = scalar_lea.vmem %s18_s13, 6144  ;;  %p587_p4 = scmp.lt.s32.totalorder %s18_s13, %s18_s13 }
   0x9   :  { %p583_p3 = scmp.ne.s32.totalorder %s18_s13, %s582_s21  ;;  %p588_p5 = scmp.lt.s32.totalorder %s582_s21, %s582_s21 }
   0xb   :  { %p589_p6 = por %p588_p5, %p587_p4 }
   0xd   :  { %p590_p7 = pnand %p589_p6, %p583_p3 }
   0xf   :  { %593 = shalt.err (!%p590_p7)
}
  0x10   :  { %s621_s22 = smov 128   ;;  %s622_s23 = smov 8  }
  0x11   :  { %23 = dma.hbm_to_vmem [thread:$0]  %s714_s1, 6144, %s18_s13, [#allocation3], %s621_s22, %s621_s22, %s622_s23  }
  0x12   :  { %616 = dma.done.wait [#allocation3], 6144  }
  0x13   :  { %617 = vsyncadd [#allocation3], 4294961152  ;;  %v623_v0 = vmov 0.0|0.0   ;;  %vm624_vm0 = vmmov 0   ;;  %v625_v1 = vmov 0.0   ;;  %v30_v2 = vld [vmem:[#allocation2] sm:$0xff] }
  0x14   :  { %493 = vmatprep.subr.bf16.mxu0 %v623_v0  ;;  %420 = vmatprep.mubr.msk.f32.mxu0 %vm624_vm0, %v625_v1  ;;  %v31_v3 = vld [vmem:[#allocation2 + $0x8] sm:$0xff]  ;;  %v32_v4 = vld [vmem:[#allocation2 + $0x10] sm:$0xff]  ;;  %v33_v6 = vld [vmem:[#allocation2 + $0x18] sm:$0xff]  ;;  %s626_s5 = smov [#allocation5]  }
  0x15   :  { %517 = vmatprep.subr.bf16.mxu1 %v623_v0  ;;  %455 = vmatprep.mubr.msk.f32.mxu1 %vm624_vm0, %v625_v1  ;;  %v494_v5 = vpack.c.bf16 %v31_v3, %v30_v2  ;;  %v497_v7 = vpack.c.bf16 %v33_v6, %v32_v4  ;;  %v34_v8 = vld [vmem:[#allocation2 + $0x20] sm:$0xff]  ;;  %v35_v9 = vld [vmem:[#allocation2 + $0x28] sm:$0xff]  ;;  %v127_v12 = vld [vmem:[#allocation2 + $0x90] sm:$0xff]  ;;  %s323_s6 = sshll.u32 %s626_s5, 4  ;;  %s324_s6 = int_to_ptr.vmem [resolvable:$true] %s323_s6 }
  0x16   :  { %v125_v10 = vld [vmem:[#allocation2 + $0x80] sm:$0xff]  ;;  %v126_v11 = vld [vmem:[#allocation2 + $0x88] sm:$0xff]  ;;  %v128_v13 = vld [vmem:[#allocation2 + $0x98] sm:$0xff]  ;;  %v500_v14 = vpack.c.bf16 %v35_v9, %v34_v8  ;;  %s594_s7 = scalar_lea.vmem %s324_s6, 128  ;;  %p599_p9 = scmp.lt.s32.totalorder %s324_s6, %s324_s6 }
  0x17   :  { %495 = vmatpush3.bf16.msra.mxu0 %v494_v5  ;;  %v518_v15 = vpack.c.bf16 %v126_v11, %v125_v10  ;;  %v36_v16 = vld [vmem:[#allocation2 + $0x30] sm:$0xff]  ;;  %v37_v17 = vld [vmem:[#allocation2 + $0x38] sm:$0xff]  ;;  %v521_v18 = vpack.c.bf16 %v128_v13, %v127_v12  ;;  %v129_v19 = vld [vmem:[#allocation2 + $0xa0] sm:$0xff]  ;;  %p595_p8 = scmp.ne.s32.totalorder %s324_s6, %s594_s7  ;;  %p600_p10 = scmp.lt.s32.totalorder %s594_s7, %s594_s7 }
  0x18   :  { %496 = vmatprep.subr.bf16.mxu0 %v623_v0  ;;  %v130_v20 = vld [vmem:[#allocation2 + $0xa8] sm:$0xff]  ;;  %v503_v21 = vpack.c.bf16 %v37_v17, %v36_v16  ;;  %v38_v22 = vld [vmem:[#allocation2 + $0x40] sm:$0xff]  ;;  %v131_v25 = vld [vmem:[#allocation2 + $0xb0] sm:$0xff] }
  0x19   :  { %519 = vmatpush3.bf16.msra.mxu1 %v518_v15  ;;  %v39_v23 = vld [vmem:[#allocation2 + $0x48] sm:$0xff]  ;;  %v524_v24 = vpack.c.bf16 %v130_v20, %v129_v19  ;;  %v132_v26 = vld [vmem:[#allocation2 + $0xb8] sm:$0xff]  ;;  %v40_v28 = vld [vmem:[#allocation2 + $0x50] sm:$0xff]  ;;  %p601_p11 = por %p600_p10, %p599_p9 }
  0x1a   :  { %520 = vmatprep.subr.bf16.mxu1 %v623_v0  ;;  %v506_v27 = vpack.c.bf16 %v39_v23, %v38_v22  ;;  %v41_v29 = vld [vmem:[#allocation2 + $0x58] sm:$0xff]  ;;  %v527_v30 = vpack.c.bf16 %v132_v26, %v131_v25  ;;  %v133_v31 = vld [vmem:[#allocation2 + $0xc0] sm:$0xff]  ;;  %v134_v32 = vld [vmem:[#allocation2 + $0xc8] sm:$0xff] }
  0x1b   :  { %498 = vmatpush3.bf16.msra.mxu0 %v497_v7  ;;  %v509_v33 = vpack.c.bf16 %v41_v29, %v40_v28  ;;  %v42_v34 = vld [vmem:[#allocation2 + $0x60] sm:$0xff]  ;;  %v43_v35 = vld [vmem:[#allocation2 + $0x68] sm:$0xff]  ;;  %v530_v36 = vpack.c.bf16 %v134_v32, %v133_v31  ;;  %v135_v37 = vld [vmem:[#allocation2 + $0xd0] sm:$0xff]  ;;  %p602_p12 = pnand %p601_p11, %p595_p8 }
  0x1c   :  { %499 = vmatprep.subr.bf16.mxu0 %v623_v0  ;;  %v136_v38 = vld [vmem:[#allocation2 + $0xd8] sm:$0xff]  ;;  %v512_v39 = vpack.c.bf16 %v43_v35, %v42_v34  ;;  %v44_v40 = vld [vmem:[#allocation2 + $0x70] sm:$0xff]  ;;  %v137_v43 = vld [vmem:[#allocation2 + $0xe0] sm:$0xff] }
  0x1d   :  { %522 = vmatpush3.bf16.msra.mxu1 %v521_v18  ;;  %v45_v41 = vld [vmem:[#allocation2 + $0x78] sm:$0xff]  ;;  %v533_v42 = vpack.c.bf16 %v136_v38, %v135_v37  ;;  %v138_v44 = vld [vmem:[#allocation2 + $0xe8] sm:$0xff]  ;;  %v29_v47 = vld [vmem:[%s713_s0] sm:$0xff] }
  0x1e   :  { %523 = vmatprep.subr.bf16.mxu1 %v623_v0  ;;  %v515_v45 = vpack.c.bf16 %v45_v41, %v44_v40  ;;  %v536_v46 = vpack.c.bf16 %v138_v44, %v137_v43  ;;  %v139_v48 = vld [vmem:[#allocation2 + $0xf0] sm:$0xff]  ;;  %v140_v49 = vld [vmem:[#allocation2 + $0xf8] sm:$0xff]  ;;  %v221_v51 = vld [vmem:[#allocation2 + $0x100] sm:$0xff] }
  0x1f   :  { %501 = vmatpush3.bf16.msra.mxu0 %v500_v14  ;;  %v539_v50 = vpack.c.bf16 %v140_v49, %v139_v48  ;;  %v222_v52 = vld [vmem:[#allocation2 + $0x108] sm:$0xff]  ;;  %v223_v53 = vld [vmem:[#allocation2 + $0x110] sm:$0xff]  ;;  %v224_v55 = vld [vmem:[#allocation2 + $0x118] sm:$0xff] }
  0x20   :  { %502 = vmatprep.subr.bf16.mxu0 %v623_v0  ;;  %v542_v54 = vpack.c.bf16 %v222_v52, %v221_v51  ;;  %v545_v56 = vpack.c.bf16 %v224_v55, %v223_v53  ;;  %v225_v57 = vld [vmem:[#allocation2 + $0x120] sm:$0xff]  ;;  %v226_v58 = vld [vmem:[#allocation2 + $0x128] sm:$0xff]  ;;  %v227_v60 = vld [vmem:[#allocation2 + $0x130] sm:$0xff] }
  0x21   :  { %525 = vmatpush3.bf16.msra.mxu1 %v524_v24  ;;  %v548_v59 = vpack.c.bf16 %v226_v58, %v225_v57  ;;  %v228_v61 = vld [vmem:[#allocation2 + $0x138] sm:$0xff]  ;;  %v229_v63 = vld [vmem:[#allocation2 + $0x140] sm:$0xff]  ;;  %v231_v3 = vld [vmem:[#allocation2 + $0x150] sm:$0xff] }
  0x22   :  { %526 = vmatprep.subr.bf16.mxu1 %v623_v0  ;;  %v551_v62 = vpack.c.bf16 %v228_v61, %v227_v60  ;;  %v232_v4 = vld [vmem:[#allocation2 + $0x158] sm:$0xff]  ;;  %v233_v6 = vld [vmem:[#allocation2 + $0x160] sm:$0xff]  ;;  %v234_v7 = vld [vmem:[#allocation2 + $0x168] sm:$0xff] }
  0x23   :  { %504 = vmatpush3.bf16.msra.mxu0 %v503_v21  ;;  %v557_v5 = vpack.c.bf16 %v232_v4, %v231_v3  ;;  %v560_v8 = vpack.c.bf16 %v234_v7, %v233_v6  ;;  %v332_v9 = vld [vmem:[%s715_s2] ss:$0 sm:$0xff]  ;;  %v235_v14 = vld [vmem:[#allocation2 + $0x170] sm:$0xff]  ;;  %v236_v15 = vld [vmem:[#allocation2 + $0x178] sm:$0xff] }
  0x24   :  { %505 = vmatprep.subr.bf16.mxu0 %v623_v0  ;;  %v563_v16 = vpack.c.bf16 %v236_v15, %v235_v14  ;;  %v334_v17 = vld [vmem:[%s715_s2 + $0x1] ss:$0 sm:$0xff]  ;;  %v336_v21 = vld [vmem:[%s715_s2 + $0x2] ss:$0 sm:$0xff] }
  0x25   :  { %528 = vmatpush3.bf16.msra.mxu1 %v527_v30 }
  0x26   :  { %529 = vmatprep.subr.bf16.mxu1 %v623_v0 }
  0x27   :  { %507 = vmatpush3.bf16.msra.mxu0 %v506_v27 }
  0x28   :  { %508 = vmatprep.subr.bf16.mxu0 %v623_v0 }
  0x29   :  { %531 = vmatpush3.bf16.msra.mxu1 %v530_v36 }
  0x2a   :  { %532 = vmatprep.subr.bf16.mxu1 %v623_v0 }
  0x2b   :  { %510 = vmatpush3.bf16.msra.mxu0 %v509_v33 }
  0x2c   :  { %511 = vmatprep.subr.bf16.mxu0 %v623_v0 }
  0x2d   :  { %534 = vmatpush3.bf16.msra.mxu1 %v533_v42 }
  0x2e   :  { %535 = vmatprep.subr.bf16.mxu1 %v623_v0 }
  0x2f   :  { %513 = vmatpush3.bf16.msra.mxu0 %v512_v39 }
  0x30   :  { %514 = vmatprep.subr.bf16.mxu0 %v623_v0 }
  0x31   :  { %537 = vmatpush3.bf16.msra.mxu1 %v536_v46 }
  0x32   :  { %538 = vmatprep.subr.bf16.mxu1 %v623_v0 }
  0x33   :  { %516 = vmatpush3.bf16.msra.mxu0 %v515_v45 }
  0x34   :  { %541 = vmatprep.subr.bf16.mxu0 %v623_v0 }
  0x35   :  { %540 = vmatpush3.bf16.msra.mxu1 %v539_v50 }
  0x36   :  { %421 = vmatmul.mubr.f32.vlgmr.msra.gmra.mrb[0].mxu0 %v29_v47 }
  0x37   :  { %490 = vmatprep.mubr.msk.f32.mxu0 %vm624_vm0, %v625_v1  ;;  %543 = vmatpush3.bf16.msra.mxu0 %v542_v54  ;;  %v230_v1 = vld [vmem:[#allocation2 + $0x148] sm:$0xff] }
  0x38   :  { %544 = vmatprep.subr.bf16.mxu0 %v623_v0  ;;  %v554_v2 = vpack.c.bf16 %v230_v1, %v229_v63 }
  0x3b   :  { %546 = vmatpush3.bf16.msra.mxu0 %v545_v56 }
  0x3c   :  { %547 = vmatprep.subr.bf16.mxu0 %v623_v0 }
  0x3f   :  { %549 = vmatpush3.bf16.msra.mxu0 %v548_v59 }
  0x40   :  { %550 = vmatprep.subr.bf16.mxu0 %v623_v0 }
  0x43   :  { %552 = vmatpush3.bf16.msra.mxu0 %v551_v62 }
  0x44   :  { %553 = vmatprep.subr.bf16.mxu0 %v623_v0 }
  0x47   :  { %555 = vmatpush3.bf16.msra.mxu0 %v554_v2 }
  0x48   :  { %556 = vmatprep.subr.bf16.mxu0 %v623_v0 }
  0x4b   :  { %558 = vmatpush3.bf16.msra.mxu0 %v557_v5 }
  0x4c   :  { %559 = vmatprep.subr.bf16.mxu0 %v623_v0 }
  0x4f   :  { %561 = vmatpush3.bf16.msra.mxu0 %v560_v8 }
  0x50   :  { %562 = vmatprep.subr.bf16.mxu0 %v623_v0 }
  0x53   :  { %564 = vmatpush3.bf16.msra.mxu0 %v563_v16 }
 0x109   :  { %v119_v10 = vpop.f32.mrb[0].mxu0 }
 0x10a   :  { %v120_v11 = vadd.f32 %v332_v9, %v119_v10  ;;  %v422_v12 = vpop.f32.mrb[1].mxu0 }
 0x10c   :  { %v123_v13 = vmax.f32 %v120_v11, 0.0 }
 0x10e   :  { %456 = vmatmul.mubr.f32.vlgmr.msra.gmra.mrb[0].mxu1 %v123_v13 }
 0x1e1   :  { %v215_v18 = vpop.f32.mrb[0].mxu1 }
 0x1e2   :  { %v216_v19 = vadd.f32 %v334_v17, %v215_v18  ;;  %v457_v0 = vpop.f32.mrb[1].mxu1 }
 0x1e4   :  { %v219_v20 = vmax.f32 %v216_v19, 0.0 }
 0x1e6   :  { %491 = vmatmul.mubr.f32.vlgmr.msra.gmra.mrb[2].mxu0 %v219_v20 }
 0x2b9   :  { %v311_v22 = vpop.f32.mrb[2].mxu0 }
 0x2ba   :  { %v312_v23 = vadd.f32 %v336_v21, %v311_v22  ;;  %v492_v24 = vpop.f32.mrb[3].mxu0 }
 0x2bc   :  { %v315_v25 = vmax.f32 %v312_v23, 0.0 }
 0x2be   :  { %316 = vst [vmem:[#allocation5] sm:$0xff] %v315_v25 }
 0x2bf   :  { %605 = shalt.err (!%p602_p12)
}
 0x2c0   :  { %s606_s10 = scalar_lea.hbm %s716_s3, 128 }
 0x2c1   :  { %p607_p13 = scmp.ne.s32.totalorder %s716_s3, %s606_s10  ;;  %p610_p0 = scmp.lt.u32.totalorder %s606_s10, %s716_s3 }
 0x2c3   :  { %p612_p1 = pnand %p610_p0, %p607_p13 }
 0x2c5   :  { %615 = shalt.err (!%p612_p1)
}
 0x2c6   :  { %326 = dma.vmem_to_hbm [thread:$0]  %s324_s6, 128, %s716_s3, [#allocation4]  }
 0x2c7   :  { %618 = dma.done.wait [#allocation4], 128  }
 0x2c8   :  { %619 = vsyncadd [#allocation4], 4294967168 }
 0x2c9   :  { %330 = vsyncpa [#allocation3], 1 }
 0x2ca   :  { %331 = vsyncpa [#allocation4], 1 }

</bundles_post_ra>
